<compile_context>
chip_gen: v7x
topology: tpu7x:2x2x1
jax: 0.10.0
libtpu: 0.0.40
codegen_flags: <defaults>
</compile_context>

<pallas_src>
import functools

import jax
import jax.numpy as jnp
from jax.experimental import pallas as pl
from jax.experimental.pallas import tpu as pltpu


def chan_norm_kernel(x_ref, g_ref, b_ref, o_ref, *, eps, fn):
    """x_ref/o_ref: (1, C, T_HW); g_ref/b_ref: (C, 1)."""
    x = x_ref[0].astype(jnp.float32)                        # (C, T_HW)
    inv_c = 1.0 / x.shape[0]
    mean = jnp.sum(x, axis=0, keepdims=True) * inv_c        # (1, T_HW)
    xc = x - mean
    var = jnp.sum(xc * xc, axis=0, keepdims=True) * inv_c   # biased (unbiased=False)
    inv_std = jax.lax.rsqrt(var + eps)                      # EUP, no divide
    g = g_ref[...].astype(jnp.float32)                      # (C, 1)
    b = b_ref[...].astype(jnp.float32)                      # (C, 1)
    y = xc * inv_std * g + b
    if fn is not None:                                      # fused elementwise fn
        y = fn(y)
    o_ref[0] = y.astype(o_ref.dtype)


def _pick_tile_hw(C, hw, itemsize, target_bytes=2 * 1024 * 1024):
    """Lane-aligned HW tile, ~target_bytes per (C, T_HW) input block."""
    t = (target_bytes // max(1, C * itemsize)) // 128 * 128
    t = max(128, t)
    hw_min = max(128, pl.cdiv(hw, 128) * 128)
    return min(hw_min, t)


def chan_norm(x, g, b, *, eps=1e-5, fn=None, tile_hw=None):
    """x: (B, C, H, W); g, b: (1, C, 1, 1) torch-layout affine params.

    If `fn` is given it must be an elementwise jnp callable and is fused into
    the kernel's final store (single HBM pass for the PreNorm composite).
    """
    B, C, H, W = x.shape
    hw = H * W
    itemsize = jnp.dtype(x.dtype).itemsize

    if tile_hw is None:
        tile_hw = _pick_tile_hw(C, hw, itemsize)

    num_tiles = pl.cdiv(hw, tile_hw)
    hw_full = num_tiles * tile_hw                           # padded, 128-aligned

    x2 = x.reshape(B, C, hw)                                # lane-dense spatial axis
    if hw_full != hw:
        # Pad once in the wrapper; padded columns normalize to harmless values
        # (var=0 -> rsqrt(eps)) and are sliced away below.
        x2 = jnp.pad(x2, ((0, 0), (0, 0), (0, hw_full - hw)))
    g2 = jnp.asarray(g, jnp.float32).reshape(C, 1)
    b2 = jnp.asarray(b, jnp.float32).reshape(C, 1)

    kernel = functools.partial(chan_norm_kernel, eps=eps, fn=fn)
    cost = pl.CostEstimate(
        flops=7 * B * C * hw_full,                          # sums, center, square, scale, shift
        transcendentals=B * hw_full * (1 if fn is None else 2),
        bytes_accessed=2 * B * C * hw_full * itemsize + 2 * C * 4,
    )

    out = pl.pallas_call(
        kernel,
        out_shape=jax.ShapeDtypeStruct((B, C, hw_full), x.dtype),
        grid=(B, num_tiles),
        in_specs=[
            pl.BlockSpec((1, C, tile_hw), lambda i, j: (i, 0, j)),
            pl.BlockSpec((C, 1), lambda i, j: (0, 0)),      # resident across grid
            pl.BlockSpec((C, 1), lambda i, j: (0, 0)),
        ],
        out_specs=pl.BlockSpec((1, C, tile_hw), lambda i, j: (i, 0, j)),
        compiler_params=pltpu.CompilerParams(
            dimension_semantics=("parallel", "parallel")),
        cost_estimate=cost,
    )(x2, g2, b2)

    if hw_full != hw:
        out = out[:, :, :hw]
    return out.reshape(B, C, H, W)


def pre_norm(x, g, b, fn=None, *, eps=1e-5, fuse_fn=True):
    """PreNorm.forward: fn(ChanNorm(x)).

    If `fuse_fn` and `fn` is elementwise, it is applied inside the kernel's
    final store; otherwise it runs as a separate JAX op after the kernel.
    # TODO(synk): `fn` is an arbitrary wrapped nn.Module in the PyTorch spec;
    # non-elementwise wrapped modules must be supplied as a JAX callable and
    # run after the Pallas ChanNorm kernel (fuse_fn=False).
    """
    if fn is not None and fuse_fn:
        return chan_norm(x, g, b, eps=eps, fn=fn)
    y = chan_norm(x, g, b, eps=eps)
    return y if fn is None else fn(y)


def pre_norm_ref(x, g, b, fn=None, *, eps=1e-5):
    """Pure-JAX reference mirroring the PyTorch PreNorm/ChanNorm."""
    x = x.astype(jnp.float32)
    mean = jnp.mean(x, axis=1, keepdims=True)
    var = jnp.mean((x - mean) ** 2, axis=1, keepdims=True)  # unbiased=False
    y = (x - mean) / jnp.sqrt(var + eps) * g + b
    return y if fn is None else fn(y)


if __name__ == "__main__":
    batch, channels, spatial = 2, 4, 16
    eps = 1e-5

    key = jax.random.PRNGKey(0)
    kx, kg, kb = jax.random.split(key, 3)

    x = jax.random.normal(kx, (batch, channels, spatial, spatial), dtype=jnp.float32)
    # ChanNorm init is g=ones, b=zeros; perturb them so the affine path is exercised.
    g = 1.0 + 0.1 * jax.random.normal(kg, (1, channels, 1, 1), dtype=jnp.float32)
    b = 0.1 * jax.random.normal(kb, (1, channels, 1, 1), dtype=jnp.float32)

    example_fn = jax.nn.gelu   # elementwise stand-in for the wrapped module `fn`

    out = pre_norm(x, g, b, example_fn, eps=eps)             # fn fused into the kernel
    out = jax.block_until_ready(out)

    ref = pre_norm_ref(x, g, b, example_fn, eps=eps)
    assert out.shape == x.shape
    assert jnp.allclose(out, ref, atol=1e-5, rtol=1e-5), "mismatch vs reference (fused)"

    # Also exercise the unfused path (arbitrary wrapped module case).
    out2 = jax.block_until_ready(pre_norm(x, g, b, example_fn, eps=eps, fuse_fn=False))
    assert jnp.allclose(out2, ref, atol=1e-5, rtol=1e-5), "mismatch vs reference (unfused)"

    print("KERNEL_OK")
</pallas_src>

<mosaic_0001>
module attributes {stable_mosaic.version = 11 : i64} {
  func.func @chan_norm_kernel(%arg0: i32, %arg1: i32, %arg2: memref<1x4x256xf32, #tpu.memory_space<vmem>>, %arg3: memref<4x1xf32, #tpu.memory_space<vmem>>, %arg4: memref<4x1xf32, #tpu.memory_space<vmem>>, %arg5: memref<1x4x256xf32, #tpu.memory_space<vmem>>) attributes {dimension_semantics = [#tpu.dimension_semantics<parallel>, #tpu.dimension_semantics<parallel>], iteration_bounds = array<i64: 2, 1>, scalar_prefetch = 0 : i64, scratch_operands = 0 : i64, tpu.core_type = #tpu.core_type<tc>, window_params = [{transform_indices = @transform_0, window_bounds = array<i64: 1, 4, 256>}, {pipeline_mode = #tpu.pipeline_mode<synchronous>, transform_indices = @transform_1, window_bounds = array<i64: 4, 1>}, {pipeline_mode = #tpu.pipeline_mode<synchronous>, transform_indices = @transform_2, window_bounds = array<i64: 4, 1>}, {transform_indices = @transform_3, window_bounds = array<i64: 1, 4, 256>}]} {
    %c0 = arith.constant 0 : index
    %c0_0 = arith.constant 0 : index
    %c0_1 = arith.constant 0 : index
    %0 = vector.load %arg2[%c0, %c0_0, %c0_1] : memref<1x4x256xf32, #tpu.memory_space<vmem>>, vector<1x4x256xf32>
    %1 = vector.shape_cast %0 : vector<1x4x256xf32> to vector<4x256xf32>
    %cst = arith.constant dense<0.000000e+00> : vector<256xf32>
    %2 = vector.multi_reduction <add>, %1, %cst [0] : vector<4x256xf32> to vector<256xf32>
    %3 = vector.shape_cast %2 : vector<256xf32> to vector<1x256xf32>
    %cst_2 = arith.constant 2.500000e-01 : f32
    %4 = vector.broadcast %cst_2 : f32 to vector<1x256xf32>
    %5 = arith.mulf %3, %4 : vector<1x256xf32>
    %6 = vector.broadcast %5 : vector<1x256xf32> to vector<4x256xf32>
    %7 = arith.subf %1, %6 : vector<4x256xf32>
    %8 = arith.mulf %7, %7 : vector<4x256xf32>
    %cst_3 = arith.constant dense<0.000000e+00> : vector<256xf32>
    %9 = vector.multi_reduction <add>, %8, %cst_3 [0] : vector<4x256xf32> to vector<256xf32>
    %10 = vector.shape_cast %9 : vector<256xf32> to vector<1x256xf32>
    %cst_4 = arith.constant 2.500000e-01 : f32
    %11 = vector.broadcast %cst_4 : f32 to vector<1x256xf32>
    %12 = arith.mulf %10, %11 : vector<1x256xf32>
    %cst_5 = arith.constant 9.99999974E-6 : f32
    %13 = vector.broadcast %cst_5 : f32 to vector<1x256xf32>
    %14 = arith.addf %12, %13 : vector<1x256xf32>
    %15 = math.rsqrt %14 : vector<1x256xf32>
    %c0_6 = arith.constant 0 : index
    %c0_7 = arith.constant 0 : index
    %16 = vector.load %arg3[%c0_6, %c0_7] : memref<4x1xf32, #tpu.memory_space<vmem>>, vector<4x1xf32>
    %c0_8 = arith.constant 0 : index
    %c0_9 = arith.constant 0 : index
    %17 = vector.load %arg4[%c0_8, %c0_9] : memref<4x1xf32, #tpu.memory_space<vmem>>, vector<4x1xf32>
    %18 = vector.broadcast %15 : vector<1x256xf32> to vector<4x256xf32>
    %19 = arith.mulf %7, %18 : vector<4x256xf32>
    %20 = vector.broadcast %16 : vector<4x1xf32> to vector<4x256xf32>
    %21 = arith.mulf %19, %20 : vector<4x256xf32>
    %22 = vector.broadcast %17 : vector<4x1xf32> to vector<4x256xf32>
    %23 = arith.addf %21, %22 : vector<4x256xf32>
    %24 = arith.mulf %23, %23 : vector<4x256xf32>
    %25 = arith.mulf %23, %24 : vector<4x256xf32>
    %cst_10 = arith.constant 4.471500e-02 : f32
    %26 = vector.broadcast %cst_10 : f32 to vector<4x256xf32>
    %27 = arith.mulf %26, %25 : vector<4x256xf32>
    %28 = arith.addf %23, %27 : vector<4x256xf32>
    %cst_11 = arith.constant 0.797884583 : f32
    %29 = vector.broadcast %cst_11 : f32 to vector<4x256xf32>
    %30 = arith.mulf %29, %28 : vector<4x256xf32>
    %31 = math.tanh %30 : vector<4x256xf32>
    %cst_12 = arith.constant 1.000000e+00 : f32
    %32 = vector.broadcast %cst_12 : f32 to vector<4x256xf32>
    %33 = arith.addf %32, %31 : vector<4x256xf32>
    %cst_13 = arith.constant 5.000000e-01 : f32
    %34 = vector.broadcast %cst_13 : f32 to vector<4x256xf32>
    %35 = arith.mulf %34, %33 : vector<4x256xf32>
    %36 = arith.mulf %23, %35 : vector<4x256xf32>
    %c0_14 = arith.constant 0 : index
    %c0_15 = arith.constant 0 : index
    %c0_16 = arith.constant 0 : index
    %37 = vector.load %arg5[%c0_14, %c0_15, %c0_16] : memref<1x4x256xf32, #tpu.memory_space<vmem>>, vector<1x4x256xf32>
    %38 = vector.shape_cast %37 : vector<1x4x256xf32> to vector<4x256xf32>
    %39 = vector.shape_cast %36 : vector<4x256xf32> to vector<1x4x256xf32>
    tpu.vector_store %arg5[%c0_14, %c0_15, %c0_16], %39 {strides = array<i32>} : memref<1x4x256xf32, #tpu.memory_space<vmem>>, vector<1x4x256xf32>,
    return
  }
  func.func @transform_0(%arg0: i32, %arg1: i32) -> (i32, i32, i32) {
    %c0_i32 = arith.constant 0 : i32
    %c0_i32_0 = arith.constant 0 : i32
    return %arg0, %c0_i32, %arg1 : i32, i32, i32
  }
  func.func @transform_1(%arg0: i32, %arg1: i32) -> (i32, i32) {
    %c0_i32 = arith.constant 0 : i32
    %c0_i32_0 = arith.constant 0 : i32
    %c0_i32_1 = arith.constant 0 : i32
    return %c0_i32, %c0_i32_0 : i32, i32
  }
  func.func @transform_2(%arg0: i32, %arg1: i32) -> (i32, i32) {
    %c0_i32 = arith.constant 0 : i32
    %c0_i32_0 = arith.constant 0 : i32
    %c0_i32_1 = arith.constant 0 : i32
    return %c0_i32, %c0_i32_0 : i32, i32
  }
  func.func @transform_3(%arg0: i32, %arg1: i32) -> (i32, i32, i32) {
    %c0_i32 = arith.constant 0 : i32
    %c0_i32_0 = arith.constant 0 : i32
    return %arg0, %c0_i32, %arg1 : i32, i32, i32
  }
}

</mosaic_0001>

<bundles_post_ra>
// kernel: tpu_custom_call.1
= control target key start
LH: loop header
LB: loop body
LE: loop exit
PB: predicated region body
PF: predicated region fallthrough
CT: control target
= control target key end

     0   :  { %8 = vsyncpa [#allocation3], 0  ;;  %s814_s0 = inlined_call_operand.hbm [shape: f32[2,4,256], index: 0, kind: input, shape index: {}]   ;;  %s815_s1 = inlined_call_operand.vmem [shape: f32[4,1], index: 1, kind: input, shape index: {}]   ;;  %s816_s2 = inlined_call_operand.vmem [shape: f32[4,1], index: 2, kind: input, shape index: {}]   ;;  %s817_s3 = inlined_call_operand.hbm [shape: f32[2,4,256], index: 3, kind: output, shape index: {}]  }
   0x1   :  { %10 = vsyncpa [#allocation3 + $0x1], 0 }
   0x2   :  { %11 = vsyncpa [#allocation4], 0 }
   0x3   :  { %13 = vsyncpa [#allocation4 + $0x1], 0  ;;  %s628_s12 = smov 0   ;;  %s630_s13 = smov 0  }
   0x4   :  { %s632_s14 = smov 0   ;;  %s634_s15 = smov 0  }
   0x5   :  { %s636_s16 = smov 0   ;;  %s638_s17 = smov 0  }
   0x6 LB: > { %s401_s18 = sadd.s32 4294967295, %s602_s17   ;;  %s402_s19 = sadd.s32 4294967294, %s602_s17   ;;  %s602_s17 = sphi %s638_s17, %s19_s17   ;;  %s598_s16 = sphi %s636_s16, %s833_s16   ;;  %s594_s15 = sphi %s634_s15, %s832_s15   ;;  %s590_s14 = sphi %s632_s14, %s831_s14   ;;  %s586_s13 = sphi %s630_s13, %s830_s13   ;;  %s582_s12 = sphi %s628_s12, %s829_s12  }
   0x7   : > { %s31_s20 = sadd.s32 1, %s598_s16  ;;  %s40_s21 = sadd.s32 1, %s590_s14 }
   0x8   : > { %p33_p0 = scmp.ge.s32.totalorder %s31_s20, 2  ;;  %p47_p1 = scmp.ne.s32.totalorder %s590_s14, %s586_s13 }
   0x9   : > { %p48_p2 = scmp.eq.s32.totalorder %s602_s17, 0  ;;  %p53_p3 = scmp.ne.s32.totalorder %s586_s13, %s582_s12 }
   0xa   : > { %s835_s20 = smov (%p33_p0, %s31_s20), 0  ;;  %p54_p5 = scmp.eq.s32.totalorder %s401_s18, 0 }
   0xb   : > { %p669_p4 = por %p48_p2, %p47_p1  ;;  %s35_s23 = ssub.s32 %s598_s16, %s835_s20 }
   0xc   : > { %p121_p6 = scmp.eq.s32.totalorder %s401_s18, 1  ;;  %p38_p7 = scmp.eq.s32.totalorder %s35_s23, 0 }
   0xd   : > { %p675_p8 = por %p54_p5, %p53_p3  ;;  %p127_p10 = scmp.eq.s32.totalorder %s402_s19, 1 }
   0xe   : > { %p679_p9 = por %p121_p6, %p47_p1  ;;  %p430_p13 = scmp.lt.s32.totalorder %s602_s17, 2 }
   0xf   : > { %s684_s26 = scalar_select %p38_p7, %s590_s14, %s40_s21  }
  0x10   : > { %s821_s25 = scalar_select %p679_p9, 1, 0 }
  0x11   : > { %p686_p11 = por %p127_p10, %p53_p3  ;;  %s153_s28 = sand.u32 1, %s590_s14  }
  0x12   : > { %s405_s29 = sshll.u32 %s153_s28, 3  ;;  %s416_s30 = sshll.u32 %s598_s16, 7 }
  0x13   : > { %s822_s27 = scalar_select %p686_p11, 1, 0 }
  0x14   : > { %s697_s6 = scalar_lea.hbm %s814_s0, %s416_s30  ;;  %s157_s7 = scalar_lea.vmem [#allocation2], %s405_s29 }
  0x15   : > { %s167_s8 = sshll.u32 %s157_s7, 4  ;;  %p703_p0 = pnand %p430_p13, %p669_p4  ;;  %s699_s8 = int_to_ptr.vmem [resolvable:$true] %s167_s8 }
  0x16   : > { %s154_s10 = scalar_lea.sflag [#allocation3], %s153_s28  ;;  %s490_s11 = scalar_lea.hbm %s697_s6, 128 }
  0x17   : > { %p491_p3 = scmp.ne.s32.totalorder %s697_s6, %s490_s11  ;;  %p492_p5 = pneg %p703_p0 }
  0x18   : > { %s495_s21 = scalar_lea.hbm %s814_s0, 256  ;;  %p496_p4 = scmp.lt.u32.totalorder %s697_s6, %s814_s0 }
  0x19   : > { %p493_p6 = pnand %p492_p5, %p491_p3  ;;  %p497_p10 = scmp.lt.u32.totalorder %s495_s21, %s490_s11 }
  0x1a   : > { %p499_p12 = scmp.lt.u32.totalorder %s490_s11, %s697_s6 }
  0x1b   : > { %p494_p7 = pneg %p493_p6  ;;  %p498_p13 = por %p497_p10, %p496_p4 }
  0x1d   : > { %p500_p1 = por %p499_p12, %p498_p13 }
  0x1f   : > { %p501_p2 = pnand %p500_p1, %p494_p7 }
  0x21   : > { %504 = shalt.err (!%p501_p2)
}
  0x22   : > { %s505_s28 = scalar_lea.vmem %s699_s8, 128  ;;  %s604_s29 = smov [#allocation2]  }
  0x23   : > { %p506_p3 = scmp.ne.s32.totalorder %s699_s8, %s505_s28  ;;  %s510_s30 = sshll.u32 %s604_s29, 4  ;;  %s511_s30 = int_to_ptr.vmem [resolvable:$false] %s510_s30 }
  0x24   : > { %s512_s4 = scalar_lea.vmem %s511_s30, 256  ;;  %p513_p9 = scmp.lt.s32.totalorder %s699_s8, %s511_s30 }
  0x25   : > { %p508_p6 = pnand %p506_p3, %p492_p5  ;;  %p514_p4 = scmp.lt.s32.totalorder %s512_s4, %s505_s28 }
  0x27   : > { %p509_p11 = pneg %p508_p6  ;;  %p515_p10 = por %p514_p4, %p513_p9 }
  0x29   : > { %p516_p12 = pnand %p515_p10, %p509_p11 }
  0x2b   : > { %519 = shalt.err (!%p516_p12)
}
  0x2c   : > { %425 = dma.hbm_to_vmem [thread:$0]  (!%p703_p0), %s697_s6, 128, %s699_s8, %s154_s10  }
  0x2d   : > { %p824_p1 = scmp.lt.s32.totalorder %s602_s17, 3  ;;  %p825_p2 = scmp.ge.s32.totalorder %s602_s17, 1 }
  0x2f   : > { %p173_p5 = pnand %p825_p2, %p824_p1 }
  0x30   : > { %s739_s5 = sand.u32 (!%p173_p5), 1, %s586_s13  }
  0x31   : > { %176 = sbr.rel (%p173_p5) target bundleno = 236 (0xec), region = 32  ;;  %s409_s7 = sshll.u32 (!%p173_p5), %s739_s5, 3 }
  0x32   : > { %s179_s11 = scalar_lea.sflag (!%p173_p5), [#allocation3], %s739_s5  ;;  %s182_s9 = scalar_lea.vmem (!%p173_p5), [#allocation2], %s409_s7 }
  0x38   : > { %573 = dma.done.wait (%p675_p8), %s179_s11, 128  }
  0x39   : > { %575 = vsyncadd (%p675_p8), %s179_s11, 4294967168  ;;  %v605_v0 = vmov 0   ;;  %v257_v1 = vld [vmem:[%s815_s1] sm:$0xf]  ;;  %vm211_vm0 = vcmask 1043456   ;;  %v271_v45 = vlaneseq  ;;  %s417_s24 = sshll.u32 %s594_s15, 7 }
  0x3a   : > { %482 = vset.pattern.permute.xlu0 %v605_v0  ;;  %v258_v2 = vld [vmem:[%s816_s2] sm:$0xf]  ;;  %v606_v43 = vmov 839922192   ;;  %s204_s19 = scalar_lea.vmem [#allocation5], %s409_s7  ;;  %s765_s28 = scalar_lea.hbm %s817_s3, %s417_s24 }
  0x3b   : > { %266 = vperm.xlu0 %482, %v257_v1   ;;  %v207_v3 = vld [vmem:[%s182_s9] sm:$0xff]  ;;  %v269_v44 = vunpack.c.l.s4 %v606_v43  ;;  %v272_v48 = vshrl.u32 %v271_v45, 7  ;;  %s317_s21 = sshll.u32 %s204_s19, 4  ;;  %s301_s29 = scalar_lea.sflag [#allocation4], %s739_s5  ;;  %s767_s21 = int_to_ptr.vmem [resolvable:$true] %s317_s21 }
  0x3c   : > { %v209_v4 = vcombine.high %v207_v3, %v207_v3  ;;  %v212_v5 = vsel %vm211_vm0, %v207_v3, 0.0  ;;  %s520_s30 = scalar_lea.vmem %s767_s21, 128  ;;  %p826_p9 = scmp.ne.s32.totalorder %s821_s25, 0 }
  0x3d   : > { %v213_v7 = vrot.slane %v212_v5, 4  ;;  %v270_v47 = vunpack.c.0.s8 %v269_v44  ;;  %p521_p8 = scmp.ne.s32.totalorder %s767_s21, %s520_s30  ;;  %s607_s15 = smov [#allocation5]  }
  0x3e   : > { %v219_v6 = vsel %vm211_vm0, %v209_v4, 0.0  ;;  %s524_s4 = sshll.u32 %s607_s15, 4  ;;  %s525_s4 = int_to_ptr.vmem [resolvable:$false] %s524_s4 }
  0x3f   : > { %279 = vperm.xlu0 %482, %v258_v2   ;;  %v220_v8 = vrot.slane %v219_v6, 4  ;;  %v214_v9 = vadd.f32 %v213_v7, %v212_v5  ;;  %v273_v50 = vsub.s32 %v270_v47, %v272_v48  ;;  %p522_p11 = pnand %p521_p8, %p826_p9  ;;  %s526_s7 = scalar_lea.vmem %s525_s4, 256 }
  0x40   : > { %p527_p7 = scmp.lt.s32.totalorder %s767_s21, %s525_s4  ;;  %p528_p13 = scmp.lt.s32.totalorder %s526_s7, %s520_s30 }
  0x41   : > { %v221_v10 = vadd.f32 %v220_v8, %v219_v6  ;;  %v215_v11 = vrot.slane %v214_v9, 2  ;;  %p523_p0 = pneg %p522_p11 }
  0x42   : > { %p529_p3 = por %p528_p13, %p527_p7 }
  0x43   : > { %v222_v12 = vrot.slane %v221_v10, 2  ;;  %v216_v13 = vadd.f32 %v215_v11, %v214_v9 }
  0x44   : > { %p530_p6 = pnand %p529_p3, %p523_p0 }
  0x45   : > { %v223_v14 = vadd.f32 %v222_v12, %v221_v10  ;;  %v217_v15 = vrot.slane %v216_v13, 1 }
  0x47   : > { %v224_v16 = vrot.slane %v223_v14, 1  ;;  %v218_v17 = vadd.f32 %v217_v15, %v216_v13 }
  0x49   : > { %v225_v18 = vadd.f32 %v224_v16, %v223_v14  ;;  %v226_v19 = vmul.f32 0.25, %v218_v17 }
  0x4b   : > { %v227_v20 = vmul.f32 0.25, %v225_v18 }
  0x4d   : > { %v230_v21 = vcombine.low %v226_v19, %v227_v20 }
  0x4f   : > { %v232_v22 = vsub.f32 %v207_v3, %v230_v21 }
  0x51   : > { %v233_v23 = vmul.f32 %v232_v22, %v232_v22 }
  0x53   : > { %v235_v24 = vcombine.high %v233_v23, %v233_v23  ;;  %v237_v25 = vsel %vm211_vm0, %v233_v23, 0.0 }
  0x54   : > { %v238_v27 = vrot.slane %v237_v25, 4 }
  0x55   : > { %v244_v26 = vsel %vm211_vm0, %v235_v24, 0.0 }
  0x56   : > { %v245_v28 = vrot.slane %v244_v26, 4  ;;  %v239_v29 = vadd.f32 %v238_v27, %v237_v25 }
  0x58   : > { %v246_v30 = vadd.f32 %v245_v28, %v244_v26  ;;  %v240_v31 = vrot.slane %v239_v29, 2 }
  0x5a   : > { %v247_v32 = vrot.slane %v246_v30, 2  ;;  %v241_v33 = vadd.f32 %v240_v31, %v239_v29 }
  0x5c   : > { %v248_v34 = vadd.f32 %v247_v32, %v246_v30  ;;  %v242_v35 = vrot.slane %v241_v33, 1 }
  0x5e   : > { %v249_v36 = vrot.slane %v248_v34, 1  ;;  %v243_v37 = vadd.f32 %v242_v35, %v241_v33 }
  0x60   : > { %v250_v38 = vadd.f32 %v249_v36, %v248_v34  ;;  %v251_v39 = vmul.f32 0.25, %v243_v37 }
  0x62   : > { %v252_v40 = vmul.f32 0.25, %v250_v38  ;;  %v253_v41 = vadd.f32 1e-05, %v251_v39 }
  0x64   : > { %v254_v42 = vadd.f32 1e-05, %v252_v40  ;;  %484 = vrsqrt.f32 %v253_v41 }
  0x66   : > { %486 = vrsqrt.f32 %v254_v42 }
  0x6e   : > { %v485_v46 = vpop.eup %484 }
  0x70   : > { %v487_v49 = vpop.eup %486 }
  0x71   : > { %v261_v51 = vcombine.low %v485_v46, %v487_v49 }
  0x73   : > { %v263_v53 = vmul.f32 %v261_v51, %v232_v22 }
  0xba   : > { %v267_v52 = vpop.permute.xlu0 %266 }
  0xbb   : > { %v274_v54 = vrot.slane %v267_v52, %v273_v50 }
  0xbd   : > { %v276_v56 = vmul.f32 %v274_v54, %v263_v53 }
  0xbe   : > { %v280_v55 = vpop.permute.xlu0 %279 }
  0xbf   : > { %v287_v57 = vrot.slane %v280_v55, %v273_v50 }
  0xc1   : > { %v289_v58 = vadd.f32 %v287_v57, %v276_v56 }
  0xc3   : > { %v290_v59 = vmul.f32 %v289_v58, %v289_v58 }
  0xc5   : > { %v291_v60 = vmul.f32 %v290_v59, %v289_v58 }
  0xc7   : > { %v292_v61 = vmul.f32 0.044715, %v291_v60 }
  0xc9   : > { %v293_v62 = vadd.f32 %v292_v61, %v289_v58 }
  0xcb   : > { %v294_v63 = vmul.f32 0.7978846, %v293_v62 }
  0xcd   : > { %488 = vtanh.f32 %v294_v63 }
  0xd7   : > { %v489_v0 = vpop.eup %488 }
  0xd8   : > { %v296_v1 = vadd.f32 1.0, %v489_v0 }
  0xda   : > { %v297_v2 = vmul.f32 0.5, %v296_v1 }
  0xdc   : > { %v298_v3 = vmul.f32 %v297_v2, %v289_v58 }
  0xde   : > { %299 = vst [vmem:[%s204_s19] sm:$0xff] %v298_v3 }
  0xdf   : > { %533 = shalt.err (!%p530_p6)
}
  0xe0   : > { %s534_s5 = scalar_lea.hbm %s765_s28, 128  ;;  %s538_s6 = scalar_lea.hbm %s817_s3, 256 }
  0xe1   : > { %p535_p4 = scmp.ne.s32.totalorder %s765_s28, %s534_s5  ;;  %p539_p1 = scmp.lt.u32.totalorder %s765_s28, %s817_s3 }
  0xe2   : > { %p540_p2 = scmp.lt.u32.totalorder %s538_s6, %s534_s5  ;;  %p542_p8 = scmp.lt.u32.totalorder %s534_s5, %s765_s28 }
  0xe3   : > { %p536_p10 = pnand %p535_p4, %p826_p9 }
  0xe4   : > { %p541_p5 = por %p540_p2, %p539_p1 }
  0xe5   : > { %p537_p12 = pneg %p536_p10 }
  0xe6   : > { %p543_p11 = por %p542_p8, %p541_p5 }
  0xe8   : > { %p544_p0 = pnand %p543_p11, %p537_p12 }
  0xea   : > { %547 = shalt.err (!%p544_p0)
}
  0xeb   : > { %420 = dma.vmem_to_hbm [thread:$0]  (%p826_p9), %s767_s21, 128, %s765_s28, %s301_s29  }
  0xec PF: > { %s329_s18 = sand.u32 1, %s582_s12   ;;  %p827_p7 = scmp.ne.s32.totalorder %s822_s27, 0 }
  0xed   : > { %p828_p13 = scmp.ge.s32.totalorder %s602_s17, 2  ;;  %s330_s24 = scalar_lea.sflag [#allocation4], %s329_s18 }
  0xef   : > { %p427_p3 = pnand %p828_p13, %p827_p7 }
  0xf1   : > { %577 = dma.done.wait (!%p427_p3), %s330_s24, 128  }
  0xf2   : > { %579 = vsyncadd (!%p427_p3), %s330_s24, 4294967168  ;;  %s19_s17 = sadd.s32 1, %s602_s17   ;;  %s829_s12 = smov %s586_s13 }
  0xf3   : > { %p16_p6 = scmp.ge.s32.totalorder %s19_s17, 4   ;;  %s830_s13 = smov %s590_s14 }
  0xf4   : > { %s831_s14 = smov %s684_s26  ;;  %s832_s15 = smov %s598_s16 }
  0xf5   : > { %s833_s16 = smov %s835_s20  ;;  %18 = sbr.rel (!%p16_p6) target bundleno = 6 (0x6), region = 77 }
  0xfc   :  { %335 = vsyncpa [#allocation3], 1 }
  0xfd   :  { %337 = vsyncpa [#allocation3 + $0x1], 1 }
  0xfe   :  { %338 = vsyncpa [#allocation4], 1 }
  0xff   :  { %340 = vsyncpa [#allocation4 + $0x1], 1 }

</bundles_post_ra>
